<compile_context>
chip_gen: v6e
topology: v6e:2x2x1
jax: 0.10.0
libtpu: 0.0.40
codegen_flags: <defaults>
</compile_context>

<pallas_src>
import functools

import jax
import jax.numpy as jnp
from jax.experimental import pallas as pl
from jax.experimental.pallas import tpu as pltpu

ENCODING_DIM = 5
INPUT_SIZE = 1
HID1, HID2 = 16, 8


def _round_up(a, m):
    return ((a + m - 1) // m) * m


def _default_replication():
    """Block-diag replication factor k: fill the native MXU contraction width."""
    try:
        kind = jax.devices()[0].device_kind.lower()
    except Exception:
        return 16
    if any(v in kind for v in ("v2", "v3", "v4", "v5")):
        return 8       # 128-wide MXU contraction
    return 16          # v6e / v7x: 256-wide MXU contraction


def _autoencoder_kernel(x_ref, a1_ref, w2_ref, w34_ref, w5_ref, a6_ref,
                        b1_ref, b2_ref, b34_ref, b5_ref, b6_ref, out_ref,
                        *, chunk):
    """Forward pass on one (k, T/k) batch tile.

    Batch samples live on the 128-wide lane axis; k independent samples are
    stacked along sublanes via block-diagonal weights, so every jnp.dot below
    contracts K = k*8 .. k*16 on the MXU.
    """
    a1 = a1_ref[...]      # (k*16, k)     layer 1 block matrix (1 -> 16)
    w2 = w2_ref[...]      # (k*8,  k*16)  layer 2 block-diag  (16 -> 8)
    w34 = w34_ref[...]    # (k*8,  k*8)   fused bottleneck    (8 -> 5 -> 8)
    w5 = w5_ref[...]      # (k*16, k*8)   layer 5 block-diag  (8 -> 16)
    a6 = a6_ref[...]      # (k,    k*16)  layer 6 block matrix (16 -> 1)
    b1 = b1_ref[...]      # (k*16, 1)
    b2 = b2_ref[...]      # (k*8,  1)
    b34 = b34_ref[...]    # (k*8,  1)
    b5 = b5_ref[...]      # (k*16, 1)
    b6 = b6_ref[...]      # (k,    1)

    def compute_chunk(col):
        xs = x_ref[:, pl.ds(col, chunk)]                                           # (k, C)
        h = jnp.maximum(jnp.dot(a1, xs, preferred_element_type=jnp.float32) + b1, 0.0)
        h = jnp.maximum(jnp.dot(w2, h, preferred_element_type=jnp.float32) + b2, 0.0)
        # Fused 8->5->8 bottleneck (no activation between those two layers).
        h = jnp.maximum(jnp.dot(w34, h, preferred_element_type=jnp.float32) + b34, 0.0)
        h = jnp.maximum(jnp.dot(w5, h, preferred_element_type=jnp.float32) + b5, 0.0)
        out_ref[:, pl.ds(col, chunk)] = (
            jnp.dot(a6, h, preferred_element_type=jnp.float32) + b6)              # (k, C)

    n_chunks = x_ref.shape[1] // chunk
    if n_chunks == 1:
        compute_chunk(0)
    else:
        def body(c, carry):
            compute_chunk(pl.multiple_of(c * chunk, chunk))
            return carry
        jax.lax.fori_loop(0, n_chunks, body, 0)


def pack_params(p, k):
    """Pack the 6 Linear layers into block-diagonal slabs for replication k.

    Input params use the (in, out) layout (y = x @ W + b); the kernel computes
    y^T = W^T @ x^T + b^T, so slabs hold (out, in) blocks on the diagonal.
    """
    f32 = jnp.float32
    hi = jax.lax.Precision.HIGHEST
    w1, b1 = p["w1"].astype(f32), p["b1"].astype(f32)   # (1,16), (1,16)
    w2, b2 = p["w2"].astype(f32), p["b2"].astype(f32)   # (16,8), (1,8)
    w3, b3 = p["w3"].astype(f32), p["b3"].astype(f32)   # (8,5),  (1,5)
    w4, b4 = p["w4"].astype(f32), p["b4"].astype(f32)   # (5,8),  (1,8)
    w5, b5 = p["w5"].astype(f32), p["b5"].astype(f32)   # (8,16), (1,16)
    w6, b6 = p["w6"].astype(f32), p["b6"].astype(f32)   # (16,1), (1,1)

    # Exact fusion of encoder L3 and decoder L1 (no activation in between).
    w34 = jnp.dot(w3, w4, precision=hi)                  # (8, 8)
    b34 = jnp.dot(b3, w4, precision=hi) + b4             # (1, 8)

    eye = jnp.eye(k, dtype=f32)
    bd = lambda w_t: jnp.kron(eye, w_t)                  # block-diag of (out,in)
    til = lambda col: jnp.tile(col, (k, 1))              # stack bias k times

    return dict(
        a1=bd(w1.T),      # (k*16, k)
        w2=bd(w2.T),      # (k*8,  k*16)
        w34=bd(w34.T),    # (k*8,  k*8)
        w5=bd(w5.T),      # (k*16, k*8)
        a6=bd(w6.T),      # (k,    k*16)
        b1=til(b1.T),     # (k*16, 1)
        b2=til(b2.T),     # (k*8,  1)
        b34=til(b34.T),   # (k*8,  1)
        b5=til(b5.T),     # (k*16, 1)
        b6=til(b6.T),     # (k,    1)
    )


def autoencoder_forward(x, params, *, rows_per_step=32768, k=None, chunk=512):
    """x: (N, 1) float32.  Returns the reconstructed (N, 1) float32 signal."""
    n, in_dim = x.shape
    assert in_dim == INPUT_SIZE, "kernel is specialized for input_size == 1"
    if k is None:
        k = _default_replication()
    assert k % 8 == 0 and k > 0, "k must be a positive multiple of 8 (sublanes)"
    assert chunk % 128 == 0 and chunk > 0, "chunk must be a multiple of 128 (lanes)"

    packed = pack_params(params, k)
    param_order = ("a1", "w2", "w34", "w5", "a6", "b1", "b2", "b34", "b5", "b6")
    param_arrays = [packed[name] for name in param_order]

    rows_unit = k * chunk
    # Rows per grid step: a multiple of rows_unit, no bigger than needed.
    tile_rows = min(max(rows_per_step, rows_unit), _round_up(n, rows_unit))
    tile_rows = _round_up(tile_rows, rows_unit)
    # v7x has 2 TensorCores per chip: keep >= 2 grid steps when there is enough
    # work so the "parallel" grid axis can be sharded across both.
    if n > rows_unit:
        tile_rows = min(tile_rows,
                        max(rows_unit, _round_up(pl.cdiv(n, 2), rows_unit)))

    n_pad = _round_up(n, tile_rows)
    grid = n_pad // tile_rows
    tc = tile_rows // k            # lanes per tile row, a multiple of `chunk`

    x_flat = x.reshape(-1).astype(jnp.float32)
    if n_pad != n:
        x_flat = jnp.pad(x_flat, (0, n_pad - n))
    x2 = x_flat.reshape(grid * k, tc)

    flops = 2 * (16 + 16 * 8 + 8 * 8 + 8 * 16 + 16) * n_pad
    param_bytes = sum(int(a.size) * 4 for a in param_arrays)
    cost = pl.CostEstimate(flops=flops, transcendentals=0,
                           bytes_accessed=8 * n_pad + param_bytes)

    out2 = pl.pallas_call(
        functools.partial(_autoencoder_kernel, chunk=chunk),
        out_shape=jax.ShapeDtypeStruct((grid * k, tc), jnp.float32),
        grid=(grid,),
        in_specs=[pl.BlockSpec((k, tc), lambda i: (i, 0))] +
                 [pl.BlockSpec(a.shape, lambda i: (0, 0)) for a in param_arrays],
        out_specs=pl.BlockSpec((k, tc), lambda i: (i, 0)),
        compiler_params=pltpu.CompilerParams(
            dimension_semantics=("parallel",),
            vmem_limit_bytes=48 * 1024 * 1024),
        cost_estimate=cost,
    )(x2, *param_arrays)

    return out2.reshape(-1)[:n].reshape(n, INPUT_SIZE)


def init_params(key):
    """Deterministic init mimicking PyTorch Linear default U(-1/sqrt(fan_in), +).

    Weights stored as (in, out), biases as (1, out)."""
    dims = [
        (INPUT_SIZE, HID1),       # encoder L1
        (HID1, HID2),             # encoder L2
        (HID2, ENCODING_DIM),     # encoder L3
        (ENCODING_DIM, HID2),     # decoder L1
        (HID2, HID1),             # decoder L2
        (HID1, INPUT_SIZE),       # decoder L3
    ]
    params = {}
    for idx, (din, dout) in enumerate(dims, start=1):
        key, kw, kb = jax.random.split(key, 3)
        bound = 1.0 / jnp.sqrt(jnp.float32(din))
        params[f"w{idx}"] = jax.random.uniform(
            kw, (din, dout), jnp.float32, minval=-bound, maxval=bound)
        params[f"b{idx}"] = jax.random.uniform(
            kb, (1, dout), jnp.float32, minval=-bound, maxval=bound)
    return params


def reference_forward(x, p):
    h = x
    h = jnp.maximum(h @ p["w1"] + p["b1"], 0.0)
    h = jnp.maximum(h @ p["w2"] + p["b2"], 0.0)
    h = h @ p["w3"] + p["b3"]
    h = jnp.maximum(h @ p["w4"] + p["b4"], 0.0)
    h = jnp.maximum(h @ p["w5"] + p["b5"], 0.0)
    return h @ p["w6"] + p["b6"]


if __name__ == "__main__":
    key = jax.random.PRNGKey(0)
    kp, kx = jax.random.split(key)

    params = init_params(kp)
    batch = 2500  # not a tile multiple: exercises padding, a 2-step grid, 2 chunks
    x = jax.random.normal(kx, (batch, INPUT_SIZE), jnp.float32)

    # Small test configuration; production defaults are k per-chip, chunk=512,
    # rows_per_step=32768.
    out = autoencoder_forward(x, params, rows_per_step=2048, k=8, chunk=128)
    out = jax.block_until_ready(out)

    ref = reference_forward(x, params)
    assert out.shape == (batch, INPUT_SIZE)
    # 2e-4 tolerance: the pack-time W3@W4 fusion reassociates f32 sums.
    assert jnp.allclose(out, ref, atol=2e-4, rtol=2e-4), "mismatch vs reference"

    print("KERNEL_OK")
</pallas_src>

<mosaic_0001>
module attributes {stable_mosaic.version = 11 : i64} {
  func.func @_autoencoder_kernel(%arg0: i32, %arg1: memref<8x256xf32, #tpu.memory_space<vmem>>, %arg2: memref<128x8xf32, #tpu.memory_space<vmem>>, %arg3: memref<64x128xf32, #tpu.memory_space<vmem>>, %arg4: memref<64x64xf32, #tpu.memory_space<vmem>>, %arg5: memref<128x64xf32, #tpu.memory_space<vmem>>, %arg6: memref<8x128xf32, #tpu.memory_space<vmem>>, %arg7: memref<128x1xf32, #tpu.memory_space<vmem>>, %arg8: memref<64x1xf32, #tpu.memory_space<vmem>>, %arg9: memref<64x1xf32, #tpu.memory_space<vmem>>, %arg10: memref<128x1xf32, #tpu.memory_space<vmem>>, %arg11: memref<8x1xf32, #tpu.memory_space<vmem>>, %arg12: memref<8x256xf32, #tpu.memory_space<vmem>>) attributes {dimension_semantics = [#tpu.dimension_semantics<parallel>], iteration_bounds = array<i64: 2>, scalar_prefetch = 0 : i64, scratch_operands = 0 : i64, tpu.core_type = #tpu.core_type<tc>, window_params = [{transform_indices = @transform_0, window_bounds = array<i64: 8, 256>}, {pipeline_mode = #tpu.pipeline_mode<synchronous>, transform_indices = @transform_1, window_bounds = array<i64: 128, 8>}, {pipeline_mode = #tpu.pipeline_mode<synchronous>, transform_indices = @transform_2, window_bounds = array<i64: 64, 128>}, {pipeline_mode = #tpu.pipeline_mode<synchronous>, transform_indices = @transform_3, window_bounds = array<i64: 64, 64>}, {pipeline_mode = #tpu.pipeline_mode<synchronous>, transform_indices = @transform_4, window_bounds = array<i64: 128, 64>}, {pipeline_mode = #tpu.pipeline_mode<synchronous>, transform_indices = @transform_5, window_bounds = array<i64: 8, 128>}, {pipeline_mode = #tpu.pipeline_mode<synchronous>, transform_indices = @transform_6, window_bounds = array<i64: 128, 1>}, {pipeline_mode = #tpu.pipeline_mode<synchronous>, transform_indices = @transform_7, window_bounds = array<i64: 64, 1>}, {pipeline_mode = #tpu.pipeline_mode<synchronous>, transform_indices = @transform_8, window_bounds = array<i64: 64, 1>}, {pipeline_mode = #tpu.pipeline_mode<synchronous>, transform_indices = @transform_9, window_bounds = array<i64: 128, 1>}, {pipeline_mode = #tpu.pipeline_mode<synchronous>, transform_indices = @transform_10, window_bounds = array<i64: 8, 1>}, {transform_indices = @transform_11, window_bounds = array<i64: 8, 256>}]} {
    %c0 = arith.constant 0 : index
    %c0_0 = arith.constant 0 : index
    %0 = vector.load %arg2[%c0, %c0_0] : memref<128x8xf32, #tpu.memory_space<vmem>>, vector<128x8xf32>
    %c0_1 = arith.constant 0 : index
    %c0_2 = arith.constant 0 : index
    %1 = vector.load %arg3[%c0_1, %c0_2] : memref<64x128xf32, #tpu.memory_space<vmem>>, vector<64x128xf32>
    %c0_3 = arith.constant 0 : index
    %c0_4 = arith.constant 0 : index
    %2 = vector.load %arg4[%c0_3, %c0_4] : memref<64x64xf32, #tpu.memory_space<vmem>>, vector<64x64xf32>
    %c0_5 = arith.constant 0 : index
    %c0_6 = arith.constant 0 : index
    %3 = vector.load %arg5[%c0_5, %c0_6] : memref<128x64xf32, #tpu.memory_space<vmem>>, vector<128x64xf32>
    %c0_7 = arith.constant 0 : index
    %c0_8 = arith.constant 0 : index
    %4 = vector.load %arg6[%c0_7, %c0_8] : memref<8x128xf32, #tpu.memory_space<vmem>>, vector<8x128xf32>
    %c0_9 = arith.constant 0 : index
    %c0_10 = arith.constant 0 : index
    %5 = vector.load %arg7[%c0_9, %c0_10] : memref<128x1xf32, #tpu.memory_space<vmem>>, vector<128x1xf32>
    %c0_11 = arith.constant 0 : index
    %c0_12 = arith.constant 0 : index
    %6 = vector.load %arg8[%c0_11, %c0_12] : memref<64x1xf32, #tpu.memory_space<vmem>>, vector<64x1xf32>
    %c0_13 = arith.constant 0 : index
    %c0_14 = arith.constant 0 : index
    %7 = vector.load %arg9[%c0_13, %c0_14] : memref<64x1xf32, #tpu.memory_space<vmem>>, vector<64x1xf32>
    %c0_15 = arith.constant 0 : index
    %c0_16 = arith.constant 0 : index
    %8 = vector.load %arg10[%c0_15, %c0_16] : memref<128x1xf32, #tpu.memory_space<vmem>>, vector<128x1xf32>
    %c0_17 = arith.constant 0 : index
    %c0_18 = arith.constant 0 : index
    %9 = vector.load %arg11[%c0_17, %c0_18] : memref<8x1xf32, #tpu.memory_space<vmem>>, vector<8x1xf32>
    %c0_i32 = arith.constant 0 : i32
    %c2_i32 = arith.constant 2 : i32
    %10 = arith.addi %c0_i32, %c2_i32 : i32
    %c1_i32 = arith.constant 1 : i32
    scf.for %arg13 = %c0_i32 to %10 step %c1_i32  : i32 {
      %c128_i32 = arith.constant 128 : i32
      %11 = arith.muli %arg13, %c128_i32 : i32
      %12 = tpu.assume_multiple %11, 128 : i32
      %c0_20 = arith.constant 0 : index
      %13 = arith.index_cast %12 : i32 to index
      %14 = vector.load %arg1[%c0_20, %13] : memref<8x256xf32, #tpu.memory_space<vmem>>, vector<8x128xf32>
      %cst = arith.constant dense<0.000000e+00> : vector<128x128xf32>
      %15 = tpu.matmul %0, %14, %cst {dimension_numbers = #tpu.dot_dimension_numbers<[1], [0], [0], [1], [0, 0, 1, 1], [], []>} : vector<128x8xf32>, vector<8x128xf32>, vector<128x128xf32> -> vector<128x128xf32>
      %16 = vector.broadcast %5 : vector<128x1xf32> to vector<128x128xf32>
      %17 = arith.addf %15, %16 : vector<128x128xf32>
      %cst_21 = arith.constant 0.000000e+00 : f32
      %18 = vector.broadcast %cst_21 : f32 to vector<128x128xf32>
      %19 = arith.maximumf %17, %18 : vector<128x128xf32>
      %cst_22 = arith.constant dense<0.000000e+00> : vector<64x128xf32>
      %20 = tpu.matmul %1, %19, %cst_22 {dimension_numbers = #tpu.dot_dimension_numbers<[1], [0], [0], [1], [0, 0, 1, 1], [], []>} : vector<64x128xf32>, vector<128x128xf32>, vector<64x128xf32> -> vector<64x128xf32>
      %21 = vector.broadcast %6 : vector<64x1xf32> to vector<64x128xf32>
      %22 = arith.addf %20, %21 : vector<64x128xf32>
      %cst_23 = arith.constant 0.000000e+00 : f32
      %23 = vector.broadcast %cst_23 : f32 to vector<64x128xf32>
      %24 = arith.maximumf %22, %23 : vector<64x128xf32>
      %cst_24 = arith.constant dense<0.000000e+00> : vector<64x128xf32>
      %25 = tpu.matmul %2, %24, %cst_24 {dimension_numbers = #tpu.dot_dimension_numbers<[1], [0], [0], [1], [0, 0, 1, 1], [], []>} : vector<64x64xf32>, vector<64x128xf32>, vector<64x128xf32> -> vector<64x128xf32>
      %26 = vector.broadcast %7 : vector<64x1xf32> to vector<64x128xf32>
      %27 = arith.addf %25, %26 : vector<64x128xf32>
      %cst_25 = arith.constant 0.000000e+00 : f32
      %28 = vector.broadcast %cst_25 : f32 to vector<64x128xf32>
      %29 = arith.maximumf %27, %28 : vector<64x128xf32>
      %cst_26 = arith.constant dense<0.000000e+00> : vector<128x128xf32>
      %30 = tpu.matmul %3, %29, %cst_26 {dimension_numbers = #tpu.dot_dimension_numbers<[1], [0], [0], [1], [0, 0, 1, 1], [], []>} : vector<128x64xf32>, vector<64x128xf32>, vector<128x128xf32> -> vector<128x128xf32>
      %31 = vector.broadcast %8 : vector<128x1xf32> to vector<128x128xf32>
      %32 = arith.addf %30, %31 : vector<128x128xf32>
      %cst_27 = arith.constant 0.000000e+00 : f32
      %33 = vector.broadcast %cst_27 : f32 to vector<128x128xf32>
      %34 = arith.maximumf %32, %33 : vector<128x128xf32>
      %cst_28 = arith.constant dense<0.000000e+00> : vector<8x128xf32>
      %35 = tpu.matmul %4, %34, %cst_28 {dimension_numbers = #tpu.dot_dimension_numbers<[1], [0], [0], [1], [0, 0, 1, 1], [], []>} : vector<8x128xf32>, vector<128x128xf32>, vector<8x128xf32> -> vector<8x128xf32>
      %36 = vector.broadcast %9 : vector<8x1xf32> to vector<8x128xf32>
      %37 = arith.addf %35, %36 : vector<8x128xf32>
      %c0_29 = arith.constant 0 : index
      %38 = arith.index_cast %12 : i32 to index
      %39 = vector.load %arg12[%c0_29, %38] : memref<8x256xf32, #tpu.memory_space<vmem>>, vector<8x128xf32>
      tpu.vector_store %arg12[%c0_29, %38], %37 {strides = array<i32>} : memref<8x256xf32, #tpu.memory_space<vmem>>, vector<8x128xf32>,
    }
    %c2_i32_19 = arith.constant 2 : i32
    return
  }
  func.func @transform_0(%arg0: i32) -> (i32, i32) {
    %c0_i32 = arith.constant 0 : i32
    %c0_i32_0 = arith.constant 0 : i32
    return %arg0, %c0_i32 : i32, i32
  }
  func.func @transform_1(%arg0: i32) -> (i32, i32) {
    %c0_i32 = arith.constant 0 : i32
    %c0_i32_0 = arith.constant 0 : i32
    %c0_i32_1 = arith.constant 0 : i32
    return %c0_i32, %c0_i32_0 : i32, i32
  }
  func.func @transform_2(%arg0: i32) -> (i32, i32) {
    %c0_i32 = arith.constant 0 : i32
    %c0_i32_0 = arith.constant 0 : i32
    %c0_i32_1 = arith.constant 0 : i32
    return %c0_i32, %c0_i32_0 : i32, i32
  }
  func.func @transform_3(%arg0: i32) -> (i32, i32) {
    %c0_i32 = arith.constant 0 : i32
    %c0_i32_0 = arith.constant 0 : i32
    %c0_i32_1 = arith.constant 0 : i32
    return %c0_i32, %c0_i32_0 : i32, i32
  }
  func.func @transform_4(%arg0: i32) -> (i32, i32) {
    %c0_i32 = arith.constant 0 : i32
    %c0_i32_0 = arith.constant 0 : i32
    %c0_i32_1 = arith.constant 0 : i32
    return %c0_i32, %c0_i32_0 : i32, i32
  }
  func.func @transform_5(%arg0: i32) -> (i32, i32) {
    %c0_i32 = arith.constant 0 : i32
    %c0_i32_0 = arith.constant 0 : i32
    %c0_i32_1 = arith.constant 0 : i32
    return %c0_i32, %c0_i32_0 : i32, i32
  }
  func.func @transform_6(%arg0: i32) -> (i32, i32) {
    %c0_i32 = arith.constant 0 : i32
    %c0_i32_0 = arith.constant 0 : i32
    %c0_i32_1 = arith.constant 0 : i32
    return %c0_i32, %c0_i32_0 : i32, i32
  }
  func.func @transform_7(%arg0: i32) -> (i32, i32) {
    %c0_i32 = arith.constant 0 : i32
    %c0_i32_0 = arith.constant 0 : i32
    %c0_i32_1 = arith.constant 0 : i32
    return %c0_i32, %c0_i32_0 : i32, i32
  }
  func.func @transform_8(%arg0: i32) -> (i32, i32) {
    %c0_i32 = arith.constant 0 : i32
    %c0_i32_0 = arith.constant 0 : i32
    %c0_i32_1 = arith.constant 0 : i32
    return %c0_i32, %c0_i32_0 : i32, i32
  }
  func.func @transform_9(%arg0: i32) -> (i32, i32) {
    %c0_i32 = arith.constant 0 : i32
    %c0_i32_0 = arith.constant 0 : i32
    %c0_i32_1 = arith.constant 0 : i32
    return %c0_i32, %c0_i32_0 : i32, i32
  }
  func.func @transform_10(%arg0: i32) -> (i32, i32) {
    %c0_i32 = arith.constant 0 : i32
    %c0_i32_0 = arith.constant 0 : i32
    %c0_i32_1 = arith.constant 0 : i32
    return %c0_i32, %c0_i32_0 : i32, i32
  }
  func.func @transform_11(%arg0: i32) -> (i32, i32) {
    %c0_i32 = arith.constant 0 : i32
    %c0_i32_0 = arith.constant 0 : i32
    return %arg0, %c0_i32 : i32, i32
  }
}

</mosaic_0001>

<bundles_post_ra>
// kernel: tpu_custom_call.1
= control target key start
LH: loop header
LB: loop body
LE: loop exit
PB: predicated region body
PF: predicated region fallthrough
CT: control target
= control target key end

     0   :  { %16 = vsyncpa [#allocation3], 0  ;;  %s2866_s0 = inlined_call_operand.vmem [shape: f32[16,256], index: 0, kind: input, shape index: {}]   ;;  %s2867_s1 = inlined_call_operand.vmem [shape: f32[128,8], index: 1, kind: input, shape index: {}]   ;;  %s2868_s2 = inlined_call_operand.vmem [shape: f32[64,128], index: 2, kind: input, shape index: {}]   ;;  %s2869_s3 = inlined_call_operand.vmem [shape: f32[64,64], index: 3, kind: input, shape index: {}]   ;;  %s2870_s4 = inlined_call_operand.vmem [shape: f32[128,64], index: 4, kind: input, shape index: {}]   ;;  %s2871_s5 = inlined_call_operand.vmem [shape: f32[8,128], index: 5, kind: input, shape index: {}]   ;;  %s2872_s6 = inlined_call_operand.vmem [shape: f32[128,1], index: 6, kind: input, shape index: {}]   ;;  %s2873_s7 = inlined_call_operand.vmem [shape: f32[64,1], index: 7, kind: input, shape index: {}]   ;;  %s2874_s8 = inlined_call_operand.vmem [shape: f32[64,1], index: 8, kind: input, shape index: {}]   ;;  %s2875_s9 = inlined_call_operand.vmem [shape: f32[128,1], index: 9, kind: input, shape index: {}]   ;;  %s2876_s10 = inlined_call_operand.vmem [shape: f32[8,1], index: 10, kind: input, shape index: {}]   ;;  %s2877_s11 = inlined_call_operand.hbm [shape: f32[16,256], index: 11, kind: output, shape index: {}]  }
   0x1   :  { %18 = vsyncpa [#allocation3 + $0x1], 0  ;;  %s2080_s17 = smov 0   ;;  %s2082_s18 = smov 0  }
   0x2   :  { %s2084_s19 = smov 0   ;;  %s2086_s20 = smov 0  }
   0x3 LB: > { %2882 = sst [smem:[#allocation5_spill]] %s2006_s19  ;;  %s2101_s21 = sadd.s32 4294967295, %s2010_s20   ;;  %s2010_s20 = sphi %s2086_s20, %s3028_s20   ;;  %s2006_s19 = sphi %s2084_s19, %s3033_s19   ;;  %s2002_s18 = sphi %s2082_s18, %s3032_s18   ;;  %s1998_s17 = sphi %s2080_s17, %s3031_s17  }
   0x4   : > { %s1566_s22 = sadd.s32 4294967294, %s2010_s20   ;;  %s2105_s23 = sadd.s32 1, %s2010_s20  }
   0x5   : > { %2883 = sst [smem:[#allocation6_spill]] %s2105_s23  ;;  %s267_s24 = sadd.s32 1, %s2006_s19 }
   0x6   : > { %s264_s25 = ssub.s32 %s2010_s20, %s2105_s23  ;;  %p277_p0 = scmp.ne.s32.totalorder %s2006_s19, %s2002_s18 }
   0x7   : > { %p265_p1 = scmp.eq.s32.totalorder %s264_s25, 0  ;;  %p278_p2 = scmp.eq.s32.totalorder %s2101_s21, 1 }
   0x8   : > { %p283_p3 = scmp.ne.s32.totalorder %s2002_s18, %s1998_s17  ;;  %p284_p4 = scmp.eq.s32.totalorder %s1566_s22, 1 }
   0x9   : > { %s2116_s26 = scalar_select %p265_p1, %s2006_s19, %s267_s24  }
   0xa   : > { %p2118_p5 = por %p278_p2, %p277_p0  ;;  %p2122_p6 = por %p284_p4, %p283_p3 }
   0xb   : > { %2884 = sst [smem:[#allocation7_spill]] %s2116_s26  ;;  %p1569_p7 = scmp.ge.s32.totalorder %s2010_s20, 1 }
   0xc   : > { %p340_p8 = scmp.lt.s32.totalorder %s2010_s20, 3 }
   0xe   : > { %p341_p9 = pnand %p1569_p7, %p340_p8 }
  0x10   : > { %344 = sbr.rel (%p341_p9) target bundleno = 1250 (0x4e2), region = 64 }
  0x15   : > { %s2878_s29 = sand.u32 1, %s2002_s18   ;;  %p380_p10 = scmp.lt.s32.totalorder %s2101_s21, 1  ;;  %v2133_v0 = vld [vmem:[%s2867_s1] sm:$0xff]  ;;  %v2138_v1 = vld [vmem:[%s2867_s1 + $0x8] sm:$0xff]  ;;  %v2143_v2 = vld [vmem:[%s2867_s1 + $0x10] sm:$0xff] }
  0x16   : > { %2887 = vst [vmem:[#allocation8_spill] sm:$0xff] %v2133_v0  ;;  %2888 = vst [vmem:[#allocation9_spill] sm:$0xff] %v2138_v1  ;;  %s2147_s22 = sshll.u32 %s2878_s29, 4  ;;  %v2152_v3 = vld [vmem:[%s2867_s1 + $0x18] sm:$0xff]  ;;  %v2157_v4 = vld [vmem:[%s2867_s1 + $0x20] sm:$0xff]  ;;  %s2631_s19 = smov 0  }
  0x17   : > { %2889 = vst [vmem:[#allocation10_spill] sm:$0xff] %v2143_v2  ;;  %2890 = vst [vmem:[#allocation11_spill] sm:$0xff] %v2152_v3  ;;  %v2162_v5 = vld [vmem:[%s2867_s1 + $0x28] sm:$0xff]  ;;  %v2167_v6 = vld [vmem:[%s2867_s1 + $0x30] sm:$0xff]  ;;  %s381_s30 = scalar_select %p380_p10, %s2101_s21, 1 }
  0x18   : > { %2891 = vst [vmem:[#allocation12_spill] sm:$0xff] %v2157_v4  ;;  %2892 = vst [vmem:[#allocation13_spill] sm:$0xff] %v2162_v5  ;;  %v2172_v7 = vld [vmem:[%s2867_s1 + $0x38] sm:$0xff]  ;;  %v2177_v8 = vld [vmem:[%s2867_s1 + $0x40] sm:$0xff]  ;;  %s379_s24 = scalar_lea.vmem [#allocation2], %s2147_s22 }
  0x19   : > { %2893 = vst [vmem:[#allocation14_spill] sm:$0xff] %v2167_v6  ;;  %2894 = vst [vmem:[#allocation15_spill] sm:$0xff] %v2172_v7  ;;  %v2183_v9 = vld [vmem:[%s2867_s1 + $0x48] sm:$0xff]  ;;  %v2188_v10 = vld [vmem:[%s2867_s1 + $0x50] sm:$0xff]  ;;  %s1621_s14 = sshll.u32 %s381_s30, 4 }
  0x1a   : > { %2895 = vst [vmem:[#allocation16_spill] sm:$0xff] %v2177_v8  ;;  %2896 = vst [vmem:[#allocation17_spill] sm:$0xff] %v2183_v9  ;;  %v2193_v11 = vld [vmem:[%s2867_s1 + $0x58] sm:$0xff]  ;;  %v2198_v12 = vld [vmem:[%s2867_s1 + $0x60] sm:$0xff]  ;;  %s2228_s13 = scalar_lea.vmem %s2866_s0, %s1621_s14 }
  0x1b   : > { %2897 = vst [vmem:[#allocation18_spill] sm:$0xff] %v2188_v10  ;;  %2898 = vst [vmem:[#allocation19_spill] sm:$0xff] %v2193_v11  ;;  %v2203_v13 = vld [vmem:[%s2867_s1 + $0x68] sm:$0xff]  ;;  %v2208_v14 = vld [vmem:[%s2867_s1 + $0x70] sm:$0xff] }
  0x1c   : > { %2899 = vst [vmem:[#allocation20_spill] sm:$0xff] %v2198_v12  ;;  %2900 = vst [vmem:[#allocation21_spill] sm:$0xff] %v2203_v13  ;;  %v2213_v15 = vld [vmem:[%s2867_s1 + $0x78] sm:$0xff]  ;;  %v2218_v16 = vld [vmem:[%s2868_s2] sm:$0xff] }
  0x1d   : > { %2901 = vst [vmem:[#allocation22_spill] sm:$0xff] %v2208_v14  ;;  %2902 = vst [vmem:[#allocation23_spill] sm:$0xff] %v2213_v15  ;;  %v2223_v17 = vld [vmem:[%s2868_s2 + $0x8] sm:$0xff]  ;;  %v2233_v18 = vld [vmem:[%s2868_s2 + $0x10] sm:$0xff] }
  0x1e   : > { %2903 = vst [vmem:[#allocation24_spill] sm:$0xff] %v2218_v16  ;;  %2904 = vst [vmem:[#allocation25_spill] sm:$0xff] %v2223_v17  ;;  %v2238_v19 = vld [vmem:[%s2868_s2 + $0x18] sm:$0xff]  ;;  %v2243_v20 = vld [vmem:[%s2868_s2 + $0x20] sm:$0xff] }
  0x1f   : > { %2905 = vst [vmem:[#allocation26_spill] sm:$0xff] %v2233_v18  ;;  %2906 = vst [vmem:[#allocation27_spill] sm:$0xff] %v2238_v19  ;;  %v2248_v21 = vld [vmem:[%s2868_s2 + $0x28] sm:$0xff]  ;;  %v2253_v22 = vld [vmem:[%s2868_s2 + $0x30] sm:$0xff] }
  0x20   : > { %2907 = vst [vmem:[#allocation28_spill] sm:$0xff] %v2243_v20  ;;  %2908 = vst [vmem:[#allocation29_spill] sm:$0xff] %v2248_v21  ;;  %v2258_v23 = vld [vmem:[%s2868_s2 + $0x38] sm:$0xff]  ;;  %v2263_v24 = vld [vmem:[%s2869_s3] sm:$0xff] }
  0x21   : > { %2909 = vst [vmem:[#allocation30_spill] sm:$0xff] %v2253_v22  ;;  %2910 = vst [vmem:[#allocation31_spill] sm:$0xff] %v2258_v23  ;;  %v2268_v25 = vld [vmem:[%s2869_s3 + $0x8] sm:$0xff]  ;;  %v2273_v26 = vld [vmem:[%s2869_s3 + $0x10] sm:$0xff] }
  0x22   : > { %2911 = vst [vmem:[#allocation32_spill] sm:$0xff] %v2263_v24  ;;  %2912 = vst [vmem:[#allocation33_spill] sm:$0xff] %v2268_v25  ;;  %v2278_v27 = vld [vmem:[%s2869_s3 + $0x18] sm:$0xff]  ;;  %v2283_v28 = vld [vmem:[%s2869_s3 + $0x20] sm:$0xff] }
  0x23   : > { %2913 = vst [vmem:[#allocation34_spill] sm:$0xff] %v2273_v26  ;;  %2914 = vst [vmem:[#allocation35_spill] sm:$0xff] %v2278_v27  ;;  %v2288_v29 = vld [vmem:[%s2869_s3 + $0x28] sm:$0xff]  ;;  %v2293_v30 = vld [vmem:[%s2869_s3 + $0x30] sm:$0xff] }
  0x24   : > { %2915 = vst [vmem:[#allocation36_spill] sm:$0xff] %v2283_v28  ;;  %2916 = vst [vmem:[#allocation37_spill] sm:$0xff] %v2288_v29  ;;  %v2298_v31 = vld [vmem:[%s2869_s3 + $0x38] sm:$0xff]  ;;  %v2303_v32 = vld [vmem:[%s2870_s4] sm:$0xff] }
  0x25   : > { %2917 = vst [vmem:[#allocation38_spill] sm:$0xff] %v2293_v30  ;;  %2918 = vst [vmem:[#allocation39_spill] sm:$0xff] %v2298_v31  ;;  %v2308_v33 = vld [vmem:[%s2870_s4 + $0x8] sm:$0xff]  ;;  %v2313_v34 = vld [vmem:[%s2870_s4 + $0x10] sm:$0xff] }
  0x26   : > { %2919 = vst [vmem:[#allocation40_spill] sm:$0xff] %v2303_v32  ;;  %2920 = vst [vmem:[#allocation41_spill] sm:$0xff] %v2308_v33  ;;  %v2318_v35 = vld [vmem:[%s2870_s4 + $0x18] sm:$0xff]  ;;  %v2323_v36 = vld [vmem:[%s2870_s4 + $0x20] sm:$0xff] }
  0x27   : > { %2921 = vst [vmem:[#allocation42_spill] sm:$0xff] %v2313_v34  ;;  %2922 = vst [vmem:[#allocation43_spill] sm:$0xff] %v2318_v35  ;;  %v2328_v37 = vld [vmem:[%s2870_s4 + $0x28] sm:$0xff]  ;;  %v2333_v38 = vld [vmem:[%s2870_s4 + $0x30] sm:$0xff] }
  0x28   : > { %2923 = vst [vmem:[#allocation44_spill] sm:$0xff] %v2323_v36  ;;  %2924 = vst [vmem:[#allocation45_spill] sm:$0xff] %v2328_v37  ;;  %v2338_v39 = vld [vmem:[%s2870_s4 + $0x38] sm:$0xff]  ;;  %v2343_v40 = vld [vmem:[%s2870_s4 + $0x40] sm:$0xff] }
  0x29   : > { %2925 = vst [vmem:[#allocation46_spill] sm:$0xff] %v2333_v38  ;;  %2926 = vst [vmem:[#allocation47_spill] sm:$0xff] %v2338_v39  ;;  %v2348_v41 = vld [vmem:[%s2870_s4 + $0x48] sm:$0xff]  ;;  %v2353_v42 = vld [vmem:[%s2870_s4 + $0x50] sm:$0xff] }
  0x2a   : > { %2927 = vst [vmem:[#allocation48_spill] sm:$0xff] %v2343_v40  ;;  %2928 = vst [vmem:[#allocation49_spill] sm:$0xff] %v2348_v41  ;;  %v2358_v43 = vld [vmem:[%s2870_s4 + $0x58] sm:$0xff]  ;;  %v2363_v44 = vld [vmem:[%s2870_s4 + $0x60] sm:$0xff] }
  0x2b   : > { %2929 = vst [vmem:[#allocation50_spill] sm:$0xff] %v2353_v42  ;;  %2930 = vst [vmem:[#allocation51_spill] sm:$0xff] %v2358_v43  ;;  %v2368_v45 = vld [vmem:[%s2870_s4 + $0x68] sm:$0xff]  ;;  %v2373_v46 = vld [vmem:[%s2870_s4 + $0x70] sm:$0xff] }
  0x2c   : > { %2931 = vst [vmem:[#allocation52_spill] sm:$0xff] %v2363_v44  ;;  %2932 = vst [vmem:[#allocation53_spill] sm:$0xff] %v2368_v45  ;;  %v2378_v47 = vld [vmem:[%s2870_s4 + $0x78] sm:$0xff]  ;;  %v2383_v48 = vld [vmem:[%s2871_s5] sm:$0xff] }
  0x2d   : > { %2933 = vst [vmem:[#allocation54_spill] sm:$0xff] %v2373_v46  ;;  %2934 = vst [vmem:[#allocation55_spill] sm:$0xff] %v2378_v47  ;;  %v2388_v49 = vld [vmem:[%s2872_s6] sm:$0xff]  ;;  %v2393_v50 = vld [vmem:[%s2872_s6 + $0x8] sm:$0xff] }
  0x2e   : > { %2935 = vst [vmem:[#allocation56_spill] sm:$0xff] %v2383_v48  ;;  %v2398_v51 = vld [vmem:[%s2872_s6 + $0x10] sm:$0xff]  ;;  %v2403_v52 = vld [vmem:[%s2872_s6 + $0x18] sm:$0xff]  ;;  %v2408_v53 = vld [vmem:[%s2872_s6 + $0x20] sm:$0xff] }
  0x2f   : > { %v2413_v54 = vld [vmem:[%s2872_s6 + $0x28] sm:$0xff]  ;;  %v2418_v55 = vld [vmem:[%s2872_s6 + $0x30] sm:$0xff]  ;;  %v2423_v56 = vld [vmem:[%s2872_s6 + $0x38] sm:$0xff] }
  0x30   : > { %v2428_v57 = vld [vmem:[%s2872_s6 + $0x40] sm:$0xff]  ;;  %v2433_v58 = vld [vmem:[%s2872_s6 + $0x48] sm:$0xff]  ;;  %v2438_v59 = vld [vmem:[%s2872_s6 + $0x50] sm:$0xff] }
  0x31   : > { %v2443_v60 = vld [vmem:[%s2872_s6 + $0x58] sm:$0xff]  ;;  %v2448_v61 = vld [vmem:[%s2872_s6 + $0x60] sm:$0xff]  ;;  %v2453_v62 = vld [vmem:[%s2872_s6 + $0x68] sm:$0xff] }
  0x32   : > { %v2458_v63 = vld [vmem:[%s2872_s6 + $0x70] sm:$0xff]  ;;  %v2463_v48 = vld [vmem:[%s2872_s6 + $0x78] sm:$0xff]  ;;  %v2468_v47 = vld [vmem:[%s2873_s7] sm:$0xff] }
  0x33   : > { %v2473_v46 = vld [vmem:[%s2873_s7 + $0x8] sm:$0xff]  ;;  %v2478_v45 = vld [vmem:[%s2873_s7 + $0x10] sm:$0xff]  ;;  %v2483_v44 = vld [vmem:[%s2873_s7 + $0x18] sm:$0xff] }
  0x34   : > { %v2488_v43 = vld [vmem:[%s2873_s7 + $0x20] sm:$0xff]  ;;  %v2493_v42 = vld [vmem:[%s2873_s7 + $0x28] sm:$0xff]  ;;  %v2498_v41 = vld [vmem:[%s2873_s7 + $0x30] sm:$0xff] }
  0x35   : > { %v2503_v40 = vld [vmem:[%s2873_s7 + $0x38] sm:$0xff]  ;;  %v2508_v39 = vld [vmem:[%s2874_s8] sm:$0xff]  ;;  %v2513_v38 = vld [vmem:[%s2874_s8 + $0x8] sm:$0xff] }
  0x36   : > { %v2518_v37 = vld [vmem:[%s2874_s8 + $0x10] sm:$0xff]  ;;  %v2523_v36 = vld [vmem:[%s2874_s8 + $0x18] sm:$0xff]  ;;  %v2528_v35 = vld [vmem:[%s2874_s8 + $0x20] sm:$0xff] }
  0x37   : > { %2936 = vst [vmem:[#allocation57_spill] sm:$0xff] %v2528_v35  ;;  %v2533_v34 = vld [vmem:[%s2874_s8 + $0x28] sm:$0xff]  ;;  %v2538_v33 = vld [vmem:[%s2874_s8 + $0x30] sm:$0xff]  ;;  %v2543_v31 = vld [vmem:[%s2874_s8 + $0x38] sm:$0xff] }
  0x38   : > { %2937 = vst [vmem:[#allocation58_spill] sm:$0xff] %v2533_v34  ;;  %2938 = vst [vmem:[#allocation59_spill] sm:$0xff] %v2538_v33  ;;  %v2548_v30 = vld [vmem:[%s2875_s9] sm:$0xff]  ;;  %v2553_v29 = vld [vmem:[%s2875_s9 + $0x8] sm:$0xff] }
  0x39   : > { %2939 = vst [vmem:[#allocation60_spill] sm:$0xff] %v2543_v31  ;;  %2940 = vst [vmem:[#allocation61_spill] sm:$0xff] %v2548_v30  ;;  %v2558_v28 = vld [vmem:[%s2875_s9 + $0x10] sm:$0xff]  ;;  %v2563_v27 = vld [vmem:[%s2875_s9 + $0x18] sm:$0xff] }
  0x3a   : > { %2941 = vst [vmem:[#allocation62_spill] sm:$0xff] %v2553_v29  ;;  %2942 = vst [vmem:[#allocation63_spill] sm:$0xff] %v2558_v28  ;;  %v2568_v26 = vld [vmem:[%s2875_s9 + $0x20] sm:$0xff]  ;;  %v2573_v25 = vld [vmem:[%s2875_s9 + $0x28] sm:$0xff] }
  0x3b   : > { %2943 = vst [vmem:[#allocation64_spill] sm:$0xff] %v2563_v27  ;;  %2944 = vst [vmem:[#allocation65_spill] sm:$0xff] %v2568_v26  ;;  %v2578_v32 = vld [vmem:[%s2875_s9 + $0x30] sm:$0xff]  ;;  %v2583_v24 = vld [vmem:[%s2875_s9 + $0x38] sm:$0xff] }
  0x3c   : > { %2945 = vst [vmem:[#allocation66_spill] sm:$0xff] %v2573_v25  ;;  %2946 = vst [vmem:[#allocation67_spill] sm:$0xff] %v2578_v32  ;;  %v2588_v23 = vld [vmem:[%s2875_s9 + $0x40] sm:$0xff]  ;;  %v2593_v22 = vld [vmem:[%s2875_s9 + $0x48] sm:$0xff] }
  0x3d   : > { %2947 = vst [vmem:[#allocation68_spill] sm:$0xff] %v2583_v24  ;;  %2948 = vst [vmem:[#allocation69_spill] sm:$0xff] %v2588_v23  ;;  %v2598_v21 = vld [vmem:[%s2875_s9 + $0x50] sm:$0xff]  ;;  %v2603_v20 = vld [vmem:[%s2875_s9 + $0x58] sm:$0xff] }
  0x3e   : > { %2949 = vst [vmem:[#allocation70_spill] sm:$0xff] %v2593_v22  ;;  %2950 = vst [vmem:[#allocation71_spill] sm:$0xff] %v2598_v21  ;;  %v2608_v19 = vld [vmem:[%s2875_s9 + $0x60] sm:$0xff]  ;;  %v2613_v18 = vld [vmem:[%s2875_s9 + $0x68] sm:$0xff] }
  0x3f   : > { %2951 = vst [vmem:[#allocation72_spill] sm:$0xff] %v2603_v20  ;;  %2952 = vst [vmem:[#allocation73_spill] sm:$0xff] %v2608_v19  ;;  %v2618_v17 = vld [vmem:[%s2875_s9 + $0x70] sm:$0xff]  ;;  %v2623_v30 = vld [vmem:[%s2875_s9 + $0x78] sm:$0xff] }
  0x40   : > { %2953 = vst [vmem:[#allocation74_spill] sm:$0xff] %v2613_v18  ;;  %2954 = vst [vmem:[#allocation75_spill] sm:$0xff] %v2618_v17  ;;  %v2628_v29 = vld [vmem:[%s2876_s10] sm:$0xff] }
  0x41   : > { %2955 = vst [vmem:[#allocation76_spill] sm:$0xff] %v2623_v30  ;;  %2956 = vst [vmem:[#allocation77_spill] sm:$0xff] %v2628_v29 }
  0x42 LB: >> { %vm575_vm0 = vcmask 64512   ;;  %v2957_v16 = vld [vmem:[#allocation24_spill] sm:$0xff]  ;;  %v2016_v28 = vmov 0   ;;  %s1573_s14 = sshll.u32 %s2014_s19, 7  ;;  %v2959_v1 = vld [vmem:[#allocation9_spill] sm:$0xff]  ;;  %v2960_v2 = vld [vmem:[#allocation10_spill] sm:$0xff]  ;;  %s2014_s19 = sphi %s2631_s19, %s488_s19  }
  0x43   : >> { %1779 = vmatprep.mubr.f32.mxu1 %v2957_v16  ;;  %1944 = vset.pattern.permute.xlu0 %v2016_v28  ;;  %v2958_v0 = vld [vmem:[#allocation8_spill] sm:$0xff]  ;;  %s2641_s25 = sshra.s32 %s1573_s14, 7  ;;  %v2961_v3 = vld [vmem:[#allocation11_spill] sm:$0xff]  ;;  %v2963_v5 = vld [vmem:[#allocation13_spill] sm:$0xff]  ;;  %vm978_vm1 = vcmask 523264   ;;  %vm2018_vm2 = vmmov 0  }
  0x44   : >> { %1723 = vmatprep.mubr.msk.f32.mxu0 %vm575_vm0, %v2958_v0  ;;  %572 = vperm.xlu0 %1944, %v2463_v48   ;;  %s1574_s23 = sshll.u32 %s2641_s25, 3  ;;  %v2962_v4 = vld [vmem:[#allocation12_spill] sm:$0xff]  ;;  %v2964_v6 = vld [vmem:[#allocation14_spill] sm:$0xff]  ;;  %v2965_v7 = vld [vmem:[#allocation15_spill] sm:$0xff]  ;;  %s488_s19 = sadd.s32 1, %s2014_s19  }
  0x45   : >> { %1945 = vset.pattern.permute.xlu1 %v2016_v28  ;;  %s493_s12 = scalar_lea.vmem %s2228_s13, %s1574_s23  ;;  %v2966_v8 = vld [vmem:[#allocation16_spill] sm:$0xff]  ;;  %v2967_v9 = vld [vmem:[#allocation17_spill] sm:$0xff]  ;;  %v2968_v10 = vld [vmem:[#allocation18_spill] sm:$0xff]  ;;  %s1481_s30 = scalar_lea.vmem %s379_s24, %s1574_s23 [#allocation2] }
  0x46   : >> { %562 = vperm.xlu1 %1945, %v2453_v62   ;;  %v494_v29 = vld [vmem:[%s493_s12] sm:$0xff]  ;;  %v2969_v11 = vld [vmem:[#allocation19_spill] sm:$0xff]  ;;  %v2971_v13 = vld [vmem:[#allocation21_spill] sm:$0xff]  ;;  %p485_p11 = scmp.ge.s32.totalorder %s488_s19, 2  }
  0x47   : >> { %1721 = vmatprep.subr.mxu0 %v494_v29  ;;  %v2970_v12 = vld [vmem:[#allocation20_spill] sm:$0xff]  ;;  %v2972_v14 = vld [vmem:[#allocation22_spill] sm:$0xff]  ;;  %v2973_v15 = vld [vmem:[#allocation23_spill] sm:$0xff]  ;;  %s1622_s15 = sshll.u32 (%p485_p11), %s2101_s21, 8  ;;  %s1498_s14 = sshll.u32 (%p485_p11), %s379_s24, 4  ;;  %s1499_s14 = int_to_ptr.vmem [resolvable:$true] %s1498_s14 }
  0x48   : >> { %567 = vperm.xlu0 %1944, %v2458_v63   ;;  %1722 = vmatpush3.msra.mxu0 %v494_v29  ;;  %v2974_v31 = vld [vmem:[#allocation60_spill] sm:$0xff]  ;;  %v2975_v33 = vld [vmem:[#allocation59_spill] sm:$0xff]  ;;  %v2976_v34 = vld [vmem:[#allocation58_spill] sm:$0xff]  ;;  %s1496_s29 = scalar_lea.hbm (%p485_p11), %s2877_s11, %s1622_s15  ;;  %s3027_s25 = sand.u32 (%p485_p11), 1, %s2002_s18  }
  0x49   : >> { %1724 = vmatmul.mubr.msk.f32.vlgmr.msra.gmra.mxu0 %vm575_vm0, %v2959_v1  ;;  %v2977_v35 = vld [vmem:[#allocation57_spill] sm:$0xff]  ;;  %v2978_v30 = vld [vmem:[#allocation76_spill] sm:$0xff]  ;;  %v2979_v17 = vld [vmem:[#allocation75_spill] sm:$0xff]  ;;  %s1484_s23 = scalar_lea.sflag (%p485_p11), [#allocation3], %s3027_s25  ;;  %s1946_s12 = scalar_lea.vmem (%p485_p11), %s1499_s14, 256 }
  0x4a   : >> { %557 = vperm.xlu1 %1945, %v2448_v61   ;;  %1726 = vmatprep.mubr.msk.f32.mxu0 %vm575_vm0, %v2960_v2  ;;  %v2980_v18 = vld [vmem:[#allocation74_spill] sm:$0xff]  ;;  %v2981_v19 = vld [vmem:[#allocation73_spill] sm:$0xff]  ;;  %v2982_v20 = vld [vmem:[#allocation72_spill] sm:$0xff]  ;;  %p1947_p12 = scmp.ne.s32.totalorder (%p485_p11), %s1499_s14, %s1946_s12  ;;  %s2019_s19 = smov (%p485_p11), [#allocation2]  }
  0x4b   : >> { %v2983_v21 = vld [vmem:[#allocation71_spill] sm:$0xff]  ;;  %v2984_v22 = vld [vmem:[#allocation70_spill] sm:$0xff]  ;;  %v2985_v23 = vld [vmem:[#allocation69_spill] sm:$0xff]  ;;  %s1950_s13 = sshll.u32 (%p485_p11), %s2019_s19, 4  ;;  %s1951_s13 = int_to_ptr.vmem [resolvable:$false] %s1950_s13 }
  0x4c   : >> { %552 = vperm.xlu0 %1944, %v2443_v60   ;;  %v2986_v24 = vld [vmem:[#allocation68_spill] sm:$0xff]  ;;  %v2987_v32 = vld [vmem:[#allocation67_spill] sm:$0xff]  ;;  %v2988_v25 = vld [vmem:[#allocation66_spill] sm:$0xff]  ;;  %p1948_p13 = pnand (%p485_p11), %p1947_p12, %p2118_p5  ;;  %p1953_p1 = scmp.lt.s32.totalorder (%p485_p11), %s1499_s14, %s1951_s13 }
  0x4d   : >> { %1727 = vmatmul.mubr.msk.f32.gmra.mxu0 %vm575_vm0, %v2961_v3  ;;  %v2989_v26 = vld [vmem:[#allocation65_spill] sm:$0xff]  ;;  %v2990_v27 = vld [vmem:[#allocation64_spill] sm:$0xff]  ;;  %v2991_v28 = vld [vmem:[#allocation63_spill] sm:$0xff] }
  0x4e   : >> { %547 = vperm.xlu1 %1945, %v2438_v59   ;;  %1729 = vmatprep.mubr.msk.f32.mxu0 %vm575_vm0, %v2962_v4  ;;  %v2992_v29 = vld [vmem:[#allocation62_spill] sm:$0xff]  ;;  %v2993_v0 = vld [vmem:[#allocation61_spill] sm:$0xff]  ;;  %p1949_p0 = pneg (%p485_p11), %p1948_p13 }
  0x4f   : >> { %v2994_v1 = vld [vmem:[#allocation77_spill] sm:$0xff] }
  0x50   : >> { %542 = vperm.xlu0 %1944, %v2433_v58  }
  0x51   : >> { %1730 = vmatmul.mubr.msk.f32.gmra.mxu0 %vm575_vm0, %v2963_v5 }
  0x52   : >> { %537 = vperm.xlu1 %1945, %v2428_v57   ;;  %1732 = vmatprep.mubr.msk.f32.mxu0 %vm575_vm0, %v2964_v6 }
  0x54   : >> { %532 = vperm.xlu0 %1944, %v2423_v56  }
  0x55   : >> { %1733 = vmatmul.mubr.msk.f32.gmra.mxu0 %vm575_vm0, %v2965_v7 }
  0x56   : >> { %527 = vperm.xlu1 %1945, %v2418_v55   ;;  %1735 = vmatprep.mubr.msk.f32.mxu0 %vm575_vm0, %v2966_v8 }
  0x58   : >> { %522 = vperm.xlu0 %1944, %v2413_v54  }
  0x59   : >> { %1736 = vmatmul.mubr.msk.f32.gmra.mxu0 %vm575_vm0, %v2967_v9 }
  0x5a   : >> { %517 = vperm.xlu1 %1945, %v2408_v53   ;;  %1738 = vmatprep.mubr.msk.f32.mxu0 %vm575_vm0, %v2968_v10 }
  0x5c   : >> { %512 = vperm.xlu0 %1944, %v2403_v52  }
  0x5d   : >> { %1739 = vmatmul.mubr.msk.f32.gmra.mxu0 %vm575_vm0, %v2969_v11 }
  0x5e   : >> { %507 = vperm.xlu1 %1945, %v2398_v51   ;;  %1741 = vmatprep.mubr.msk.f32.mxu0 %vm575_vm0, %v2970_v12 }
  0x60   : >> { %502 = vperm.xlu0 %1944, %v2393_v50  }
  0x61   : >> { %1742 = vmatmul.mubr.msk.f32.gmra.mxu0 %vm575_vm0, %v2971_v13 }
  0x62   : >> { %497 = vperm.xlu1 %1945, %v2388_v49   ;;  %1744 = vmatprep.mubr.msk.f32.mxu0 %vm575_vm0, %v2972_v14 }
  0x64   : >> { %822 = vperm.xlu0 %1944, %v2503_v40  }
  0x65   : >> { %1745 = vmatmul.mubr.msk.f32.gmra.mxu0 %vm575_vm0, %v2973_v15 }
  0x66   : >> { %817 = vperm.xlu1 %1945, %v2498_v41  }
  0x68   : >> { %812 = vperm.xlu0 %1944, %v2493_v42  }
  0x6a   : >> { %807 = vperm.xlu1 %1945, %v2488_v43  }
  0x6c   : >> { %802 = vperm.xlu0 %1944, %v2483_v44  }
  0x6e   : >> { %797 = vperm.xlu1 %1945, %v2478_v45  }
  0x70   : >> { %792 = vperm.xlu0 %1944, %v2473_v46  }
  0x72   : >> { %787 = vperm.xlu1 %1945, %v2468_v47  }
  0x74   : >> { %975 = vperm.xlu0 %1944, %v2974_v31  }
  0x76   : >> { %970 = vperm.xlu1 %1945, %v2975_v33  }
  0x78   : >> { %965 = vperm.xlu0 %1944, %v2976_v34  }
  0x7a   : >> { %960 = vperm.xlu1 %1945, %v2977_v35  }
  0x7c   : >> { %955 = vperm.xlu0 %1944, %v2523_v36  }
  0x7e   : >> { %950 = vperm.xlu1 %1945, %v2518_v37  }
  0x80   : >> { %945 = vperm.xlu0 %1944, %v2513_v38  }
  0x82   : >> { %940 = vperm.xlu1 %1945, %v2508_v39  }
  0x84   : >> { %1193 = vperm.xlu0 %1944, %v2978_v30  }
  0x86   : >> { %1188 = vperm.xlu1 %1945, %v2979_v17  }
  0x88   : >> { %1183 = vperm.xlu0 %1944, %v2980_v18  }
  0x8a   : >> { %1178 = vperm.xlu1 %1945, %v2981_v19  }
  0x8c   : >> { %1173 = vperm.xlu0 %1944, %v2982_v20  }
  0x8e   : >> { %1168 = vperm.xlu1 %1945, %v2983_v21  }
  0x90   : >> { %1163 = vperm.xlu0 %1944, %v2984_v22  }
  0x92   : >> { %1158 = vperm.xlu1 %1945, %v2985_v23  }
  0x94   : >> { %1153 = vperm.xlu0 %1944, %v2986_v24  }
  0x96   : >> { %1148 = vperm.xlu1 %1945, %v2987_v32  }
  0x98   : >> { %1143 = vperm.xlu0 %1944, %v2988_v25  }
  0x9a   : >> { %1138 = vperm.xlu1 %1945, %v2989_v26  }
  0x9c   : >> { %1133 = vperm.xlu0 %1944, %v2990_v27  }
  0x9e   : >> { %1128 = vperm.xlu1 %1945, %v2991_v28  }
  0xa0   : >> { %1123 = vperm.xlu0 %1944, %v2992_v29  }
  0xa2   : >> { %1118 = vperm.xlu1 %1945, %v2993_v0  }
  0xa4   : >> { %1407 = vperm.xlu0 %1944, %v2994_v1  }
  0xbf   : >> { %v573_v8 = vpop.permute.xlu0 %572 }
  0xc1   : >> { %v563_v10 = vpop.permute.xlu1 %562 }
  0xc3   : >> { %v568_v29 = vpop.permute.xlu0 %567 }
  0xc5   : >> { %v558_v0 = vpop.permute.xlu1 %557 }
  0xc7   : >> { %v553_v14 = vpop.permute.xlu0 %552 }
  0xc9   : >> { %v548_v16 = vpop.permute.xlu1 %547 }
  0xcb   : >> { %v543_v20 = vpop.permute.xlu0 %542 }
  0xcd   : >> { %v538_v25 = vpop.permute.xlu1 %537 }
  0xcf   : >> { %v533_v32 = vpop.permute.xlu0 %532 }
  0xd1   : >> { %v528_v35 = vpop.permute.xlu1 %527 }
 0x109   : >> { %v2725_v2 = vpop.f32.mrf.mxu0 }
 0x10b   : >> { %v2727_v3 = vpop.f32.mrf.mxu0 }
 0x10d   : >> { %v2729_v4 = vpop.f32.mrf.mxu0 }
 0x10f   : >> { %v2731_v5 = vpop.f32.mrf.mxu0 }
 0x111   : >> { %v1731_v6 = vpop.f32.mrf.mxu0 }
 0x113   : >> { %v710_v7 = vpop.f32.mrf.mxu0 }
 0x115   : >> { %v1734_v9 = vpop.f32.mrf.mxu0 }
 0x117   : >> { %v720_v28 = vpop.f32.mrf.mxu0 }
 0x119   : >> { %v1737_v11 = vpop.f32.mrf.mxu0 }
 0x11b   : >> { %v730_v12 = vpop.f32.mrf.mxu0 }
 0x11d   : >> { %v1740_v13 = vpop.f32.mrf.mxu0 }
 0x11e   : >> { %v746_v30 = vadd.f32 %v1740_v13, %v553_v14  ;;  %v518_v14 = vpop.permute.xlu1 %517 }
 0x11f   : >> { %v740_v1 = vpop.f32.mrf.mxu0 }
 0x120   : >> { %v741_v33 = vadd.f32 %v740_v1, %v548_v16  ;;  %v3002_v1 = vld [vmem:[#allocation32_spill] sm:$0xff] }
 0x121   : >> { %v1743_v15 = vpop.f32.mrf.mxu0  ;;  %1807 = vmatprep.mubr.msk.f32.mxu0 %vm978_vm1, %v3002_v1  ;;  %v3006_v1 = vld [vmem:[#allocation35_spill] sm:$0xff] }
 0x122   : >> { %v756_v22 = vadd.f32 %v1743_v15, %v563_v10  ;;  %v731_v10 = vadd.f32 %v730_v12, %v538_v25  ;;  %v779_v15 = vmax.f32 %v741_v33, 0.0 }
 0x123   : >> { %v750_v17 = vpop.f32.mrf.mxu0 }
 0x124   : >> { %v751_v26 = vadd.f32 %v750_v17, %v558_v0  ;;  %v782_v31 = vmax.f32 %v756_v22, 0.0  ;;  %v523_v17 = vpop.permute.xlu0 %522  ;;  %v777_v16 = vmax.f32 %v731_v10, 0.0  ;;  %v3001_v0 = vld [vmem:[#allocation31_spill] sm:$0xff] }
 0x125   : >> { %v1746_v18 = vpop.f32.mrf.mxu0  ;;  %v716_v22 = vadd.f32 %v1731_v6, %v523_v17 }
 0x126   : >> { %v766_v19 = vadd.f32 %v1746_v18, %v573_v8  ;;  %v781_v34 = vmax.f32 %v751_v26, 0.0  ;;  %v736_v8 = vadd.f32 %v1737_v11, %v543_v20  ;;  %v780_v18 = vmax.f32 %v746_v30, 0.0 }
 0x127   : >> { %v760_v21 = vpop.f32.mrf.mxu0  ;;  %v711_v20 = vadd.f32 %v710_v7, %v518_v14  ;;  %v774_v25 = vmax.f32 %v716_v22, 0.0 }
 0x128   : >> { %v784_v23 = vmax.f32 %v766_v19, 0.0  ;;  %v761_v24 = vadd.f32 %v760_v21, %v568_v29  ;;  %v726_v19 = vadd.f32 %v1734_v9, %v533_v32  ;;  %v778_v13 = vmax.f32 %v736_v8, 0.0  ;;  %v513_v11 = vpop.permute.xlu0 %512  ;;  %v3000_v29 = vld [vmem:[#allocation30_spill] sm:$0xff]  ;;  %v3003_v8 = vld [vmem:[#allocation40_spill] sm:$0xff] }
 0x129   : >> { %v721_v21 = vadd.f32 %v720_v28, %v528_v35  ;;  %v706_v9 = vadd.f32 %v2729_v4, %v513_v11  ;;  %v2997_v35 = vld [vmem:[#allocation27_spill] sm:$0xff]  ;;  %v2998_v28 = vld [vmem:[#allocation28_spill] sm:$0xff] }
 0x12a   : >> { %v783_v27 = vmax.f32 %v761_v24, 0.0  ;;  %1747 = vmatprep.subr.mxu1 %v784_v23  ;;  %v508_v24 = vpop.permute.xlu1 %507 }
 0x12b   : >> { %1748 = vmatpush3.msra.mxu1 %v784_v23  ;;  %v776_v23 = vmax.f32 %v726_v19, 0.0  ;;  %v775_v12 = vmax.f32 %v721_v21, 0.0  ;;  %v701_v26 = vadd.f32 %v2731_v5, %v508_v24  ;;  %v2995_v5 = vld [vmem:[#allocation25_spill] sm:$0xff] }
 0x12c   : >> { %1749 = vmatprep.subr.mxu1 %v783_v27  ;;  %v503_v30 = vpop.permute.xlu0 %502 }
 0x12d   : >> { %1750 = vmatpush3.msra.mxu1 %v783_v27  ;;  %v773_v27 = vmax.f32 %v711_v20, 0.0  ;;  %v696_v6 = vadd.f32 %v2725_v2, %v503_v30  ;;  %v771_v33 = vmax.f32 %v701_v26, 0.0  ;;  %v2996_v2 = vld [vmem:[#allocation26_spill] sm:$0xff] }
 0x12e   : >> { %1751 = vmatprep.subr.mxu1 %v782_v31  ;;  %v498_v7 = vpop.permute.xlu1 %497 }
 0x12f   : >> { %1752 = vmatpush3.msra.mxu1 %v782_v31  ;;  %v772_v31 = vmax.f32 %v706_v9, 0.0  ;;  %v691_v32 = vadd.f32 %v2727_v3, %v498_v7  ;;  %v770_v4 = vmax.f32 %v696_v6, 0.0  ;;  %v2999_v3 = vld [vmem:[#allocation29_spill] sm:$0xff] }
 0x130   : >> { %1753 = vmatprep.subr.mxu1 %v781_v34 }
 0x131   : >> { %1754 = vmatpush3.msra.mxu1 %v781_v34  ;;  %v769_v34 = vmax.f32 %v691_v32, 0.0 }
 0x132   : >> { %1755 = vmatprep.subr.mxu1 %v780_v18  ;;  %v818_v19 = vpop.permute.xlu1 %817 }
 0x133   : >> { %1756 = vmatpush3.msra.mxu1 %v780_v18 }
 0x134   : >> { %1757 = vmatprep.subr.mxu1 %v779_v15 }
 0x135   : >> { %1758 = vmatpush3.msra.mxu1 %v779_v15  ;;  %v823_v15 = vpop.permute.xlu0 %822 }
 0x136   : >> { %1759 = vmatprep.subr.mxu1 %v778_v13  ;;  %v808_v22 = vpop.permute.xlu1 %807 }
 0x137   : >> { %1760 = vmatpush3.msra.mxu1 %v778_v13 }
 0x138   : >> { %1761 = vmatprep.subr.mxu1 %v777_v16 }
 0x139   : >> { %1762 = vmatpush3.msra.mxu1 %v777_v16  ;;  %v813_v21 = vpop.permute.xlu0 %812 }
 0x13a   : >> { %1763 = vmatprep.subr.mxu1 %v776_v23  ;;  %v798_v30 = vpop.permute.xlu1 %797 }
 0x13b   : >> { %1764 = vmatpush3.msra.mxu1 %v776_v23 }
 0x13c   : >> { %1765 = vmatprep.subr.mxu1 %v775_v12 }
 0x13d   : >> { %1766 = vmatpush3.msra.mxu1 %v775_v12 }
 0x13e   : >> { %1767 = vmatprep.subr.mxu1 %v774_v25 }
 0x13f   : >> { %1768 = vmatpush3.msra.mxu1 %v774_v25  ;;  %v803_v25 = vpop.permute.xlu0 %802 }
 0x140   : >> { %1769 = vmatprep.subr.mxu1 %v773_v27 }
 0x141   : >> { %1770 = vmatpush3.msra.mxu1 %v773_v27 }
 0x142   : >> { %1771 = vmatprep.subr.mxu1 %v772_v31 }
 0x143   : >> { %1772 = vmatpush3.msra.mxu1 %v772_v31 }
 0x144   : >> { %1773 = vmatprep.subr.mxu1 %v771_v33 }
 0x145   : >> { %1774 = vmatpush3.msra.mxu1 %v771_v33  ;;  %v793_v33 = vpop.permute.xlu0 %792 }
 0x146   : >> { %1775 = vmatprep.subr.mxu1 %v770_v4 }
 0x147   : >> { %1776 = vmatpush3.msra.mxu1 %v770_v4 }
 0x148   : >> { %1777 = vmatprep.subr.mxu1 %v769_v34 }
 0x149   : >> { %1778 = vmatpush3.msra.mxu1 %v769_v34 }
 0x14a   : >> { %1780 = vmatmul.mubr.f32.vlgmr.msra.gmra.mxu1 %v2995_v5  ;;  %v788_v5 = vpop.permute.xlu1 %787 }
 0x14b   : >> { %1782 = vmatprep.mubr.f32.mxu1 %v2996_v2 }
 0x14e   : >> { %1783 = vmatmul.mubr.f32.gmra.mxu1 %v2997_v35 }
 0x14f   : >> { %1785 = vmatprep.mubr.f32.mxu1 %v2998_v28 }
 0x152   : >> { %1786 = vmatmul.mubr.f32.gmra.mxu1 %v2999_v3 }
 0x153   : >> { %1788 = vmatprep.mubr.f32.mxu1 %v3000_v29  ;;  %v3004_v29 = vld [vmem:[#allocation33_spill] sm:$0xff] }
 0x156   : >> { %1789 = vmatmul.mubr.f32.gmra.mxu1 %v3001_v0  ;;  %v3005_v0 = vld [vmem:[#allocation34_spill] sm:$0xff] }
 0x157   : >> { %1835 = vmatprep.mubr.msk.f32.mxu1 %vm978_vm1, %v3003_v8  ;;  %v3007_v8 = vld [vmem:[#allocation36_spill] sm:$0xff] }
 0x20a   : >> { %v1781_v18 = vpop.f32.mrf.mxu1 }
 0x20b   : >> { %v897_v4 = vadd.f32 %v1781_v18, %v793_v33  ;;  %v3008_v18 = vld [vmem:[#allocation37_spill] sm:$0xff] }
 0x20c   : >> { %v891_v10 = vpop.f32.mrf.mxu1 }
 0x20d   : >> { %v892_v2 = vadd.f32 %v891_v10, %v788_v5  ;;  %v931_v28 = vmax.f32 %v897_v4, 0.0  ;;  %v3009_v10 = vld [vmem:[#allocation38_spill] sm:$0xff] }
 0x20e   : >> { %v1784_v17 = vpop.f32.mrf.mxu1 }
 0x20f   : >> { %v907_v6 = vadd.f32 %v1784_v17, %v803_v25  ;;  %v930_v3 = vmax.f32 %v892_v2, 0.0 }
 0x210   : >> { %v901_v13 = vpop.f32.mrf.mxu1 }
 0x211   : >> { %v902_v7 = vadd.f32 %v901_v13, %v798_v30  ;;  %v933_v34 = vmax.f32 %v907_v6, 0.0  ;;  %v976_v13 = vpop.permute.xlu0 %975 }
 0x212   : >> { %v1787_v14 = vpop.f32.mrf.mxu1 }
 0x213   : >> { %v917_v12 = vadd.f32 %v1787_v14, %v813_v21  ;;  %v932_v35 = vmax.f32 %v902_v7, 0.0  ;;  %v971_v21 = vpop.permute.xlu1 %970 }
 0x214   : >> { %v911_v16 = vpop.f32.mrf.mxu1 }
 0x215   : >> { %v912_v26 = vadd.f32 %v911_v16, %v808_v22  ;;  %v935_v31 = vmax.f32 %v917_v12, 0.0 }
 0x216   : >> { %v1790_v23 = vpop.f32.mrf.mxu1 }
 0x217   : >> { %v927_v11 = vadd.f32 %v1790_v23, %v823_v15  ;;  %v934_v32 = vmax.f32 %v912_v26, 0.0  ;;  %v3010_v15 = vld [vmem:[#allocation39_spill] sm:$0xff]  ;;  %v966_v23 = vpop.permute.xlu0 %965 }
 0x218   : >> { %v921_v20 = vpop.f32.mrf.mxu1 }
 0x219   : >> { %v937_v24 = vmax.f32 %v927_v11, 0.0  ;;  %v922_v9 = vadd.f32 %v921_v20, %v818_v19  ;;  %v961_v20 = vpop.permute.xlu1 %960 }
 0x21b   : >> { %v936_v27 = vmax.f32 %v922_v9, 0.0  ;;  %1791 = vmatprep.subr.mxu0 %v937_v24  ;;  %v956_v30 = vpop.permute.xlu0 %955 }
 0x21c   : >> { %1792 = vmatpush3.msra.mxu0 %v937_v24 }
 0x21d   : >> { %1793 = vmatprep.subr.mxu0 %v936_v27  ;;  %v951_v7 = vpop.permute.xlu1 %950 }
 0x21e   : >> { %1794 = vmatpush3.msra.mxu0 %v936_v27 }
 0x21f   : >> { %1795 = vmatprep.subr.mxu0 %v935_v31  ;;  %v946_v5 = vpop.permute.xlu0 %945 }
 0x220   : >> { %1796 = vmatpush3.msra.mxu0 %v935_v31 }
 0x221   : >> { %1797 = vmatprep.subr.mxu0 %v934_v32 }
 0x222   : >> { %1798 = vmatpush3.msra.mxu0 %v934_v32 }
 0x223   : >> { %1799 = vmatprep.subr.mxu0 %v933_v34 }
 0x224   : >> { %1800 = vmatpush3.msra.mxu0 %v933_v34 }
 0x225   : >> { %1801 = vmatprep.subr.mxu0 %v932_v35 }
 0x226   : >> { %1802 = vmatpush3.msra.mxu0 %v932_v35 }
 0x227   : >> { %1803 = vmatprep.subr.mxu0 %v931_v28 }
 0x228   : >> { %1804 = vmatpush3.msra.mxu0 %v931_v28  ;;  %v941_v28 = vpop.permute.xlu1 %940 }
 0x229   : >> { %1805 = vmatprep.subr.mxu0 %v930_v3 }
 0x22a   : >> { %1806 = vmatpush3.msra.mxu0 %v930_v3 }
 0x22b   : >> { %1808 = vmatmul.mubr.msk.f32.vlgmr.msra.gmra.mxu0 %vm978_vm1, %v3004_v29 }
 0x22c   : >> { %1810 = vmatprep.mubr.msk.f32.mxu0 %vm978_vm1, %v3005_v0 }
 0x22f   : >> { %1811 = vmatmul.mubr.msk.f32.gmra.mxu0 %vm978_vm1, %v3006_v1 }
 0x230   : >> { %1813 = vmatprep.mubr.msk.f32.mxu0 %vm978_vm1, %v3007_v8  ;;  %v3011_v8 = vld [vmem:[#allocation41_spill] sm:$0xff] }
 0x233   : >> { %1814 = vmatmul.mubr.msk.f32.gmra.mxu0 %vm978_vm1, %v3008_v18  ;;  %v3012_v18 = vld [vmem:[#allocation42_spill] sm:$0xff] }
 0x234   : >> { %1816 = vmatprep.mubr.msk.f32.mxu0 %vm978_vm1, %v3009_v10  ;;  %v3013_v10 = vld [vmem:[#allocation43_spill] sm:$0xff] }
 0x237   : >> { %1817 = vmatmul.mubr.msk.f32.gmra.mxu0 %vm978_vm1, %v3010_v15  ;;  %v3014_v15 = vld [vmem:[#allocation44_spill] sm:$0xff] }
 0x2eb   : >> { %v1809_v17 = vpop.f32.mrf.mxu0 }
 0x2ec   : >> { %v1075_v2 = vadd.f32 %v1809_v17, %v946_v5  ;;  %v3015_v17 = vld [vmem:[#allocation45_spill] sm:$0xff] }
 0x2ed   : >> { %v1069_v19 = vpop.f32.mrf.mxu0 }
 0x2ee   : >> { %v1070_v3 = vadd.f32 %v1069_v19, %v941_v28  ;;  %v1109_v0 = vmax.f32 %v1075_v2, 0.0  ;;  %v3016_v19 = vld [vmem:[#allocation46_spill] sm:$0xff] }
 0x2ef   : >> { %v1812_v14 = vpop.f32.mrf.mxu0 }
 0x2f0   : >> { %v1085_v32 = vadd.f32 %v1812_v14, %v956_v30  ;;  %v1108_v1 = vmax.f32 %v1070_v3, 0.0  ;;  %v3018_v14 = vld [vmem:[#allocation48_spill] sm:$0xff] }
 0x2f1   : >> { %v1079_v16 = vpop.f32.mrf.mxu0 }
 0x2f2   : >> { %v1080_v4 = vadd.f32 %v1079_v16, %v951_v7  ;;  %v1111_v35 = vmax.f32 %v1085_v32, 0.0  ;;  %v3020_v16 = vld [vmem:[#allocation50_spill] sm:$0xff]  ;;  %v1189_v32 = vpop.permute.xlu1 %1188 }
 0x2f3   : >> { %v1815_v22 = vpop.f32.mrf.mxu0 }
 0x2f4   : >> { %v1095_v25 = vadd.f32 %v1815_v22, %v966_v23  ;;  %v1110_v29 = vmax.f32 %v1080_v4, 0.0  ;;  %v3021_v22 = vld [vmem:[#allocation51_spill] sm:$0xff]  ;;  %v3022_v23 = vld [vmem:[#allocation52_spill] sm:$0xff] }
 0x2f5   : >> { %v1089_v11 = vpop.f32.mrf.mxu0 }
 0x2f6   : >> { %v1090_v6 = vadd.f32 %v1089_v11, %v961_v20  ;;  %v1113_v33 = vmax.f32 %v1095_v25, 0.0  ;;  %v3023_v11 = vld [vmem:[#allocation53_spill] sm:$0xff]  ;;  %v3024_v20 = vld [vmem:[#allocation54_spill] sm:$0xff]  ;;  %v1179_v2 = vpop.permute.xlu1 %1178 }
 0x2f7   : >> { %v1818_v12 = vpop.f32.mrf.mxu0 }
 0x2f8   : >> { %v1105_v24 = vadd.f32 %v1818_v12, %v976_v13  ;;  %v1112_v34 = vmax.f32 %v1090_v6, 0.0  ;;  %v3017_v13 = vld [vmem:[#allocation47_spill] sm:$0xff] }
 0x2f9   : >> { %v1099_v9 = vpop.f32.mrf.mxu0  ;;  %v3025_v12 = vld [vmem:[#allocation55_spill] sm:$0xff] }
 0x2fa   : >> { %v1115_v26 = vmax.f32 %v1105_v24, 0.0  ;;  %v1100_v27 = vadd.f32 %v1099_v9, %v971_v21  ;;  %v3019_v21 = vld [vmem:[#allocation49_spill] sm:$0xff]  ;;  %v2017_v24 = vmov 0.0  }
 0x2fb   : >> { %1859 = vmatprep.subr.mxu0 %v2017_v24  ;;  %1891 = vmatprep.mubr.msk.f32.mxu0 %vm2018_vm2, %v2017_v24 }
 0x2fc   : >> { %v1114_v31 = vmax.f32 %v1100_v27, 0.0  ;;  %1819 = vmatprep.subr.mxu1 %v1115_v26 }
 0x2fd   : >> { %1820 = vmatpush3.msra.mxu1 %v1115_v26 }
 0x2fe   : >> { %1821 = vmatprep.subr.mxu1 %v1114_v31 }
 0x2ff   : >> { %1822 = vmatpush3.msra.mxu1 %v1114_v31  ;;  %v1194_v31 = vpop.permute.xlu0 %1193 }
 0x300   : >> { %1823 = vmatprep.subr.mxu1 %v1113_v33 }
 0x301   : >> { %1824 = vmatpush3.msra.mxu1 %v1113_v33 }
 0x302   : >> { %1825 = vmatprep.subr.mxu1 %v1112_v34 }
 0x303   : >> { %1826 = vmatpush3.msra.mxu1 %v1112_v34  ;;  %v1184_v34 = vpop.permute.xlu0 %1183 }
 0x304   : >> { %1827 = vmatprep.subr.mxu1 %v1111_v35 }
 0x305   : >> { %1828 = vmatpush3.msra.mxu1 %v1111_v35 }
 0x306   : >> { %1829 = vmatprep.subr.mxu1 %v1110_v29 }
 0x307   : >> { %1830 = vmatpush3.msra.mxu1 %v1110_v29  ;;  %v1174_v3 = vpop.permute.xlu0 %1173 }
 0x308   : >> { %1831 = vmatprep.subr.mxu1 %v1109_v0 }
 0x309   : >> { %1832 = vmatpush3.msra.mxu1 %v1109_v0  ;;  %v1169_v0 = vpop.permute.xlu1 %1168 }
 0x30a   : >> { %1833 = vmatprep.subr.mxu1 %v1108_v1 }
 0x30b   : >> { %1834 = vmatpush3.msra.mxu1 %v1108_v1 }
 0x30c   : >> { %1836 = vmatmul.mubr.msk.f32.vlgmr.msra.gmra.mxu1 %vm978_vm1, %v3011_v8 }
 0x30d   : >> { %1838 = vmatprep.mubr.msk.f32.mxu1 %vm978_vm1, %v3012_v18 }
 0x310   : >> { %1839 = vmatmul.mubr.msk.f32.gmra.mxu1 %vm978_vm1, %v3013_v10  ;;  %v1164_v10 = vpop.permute.xlu0 %1163 }
 0x311   : >> { %1841 = vmatprep.mubr.msk.f32.mxu1 %vm978_vm1, %v3014_v15 }
 0x314   : >> { %1842 = vmatmul.mubr.msk.f32.gmra.mxu1 %vm978_vm1, %v3015_v17 }
 0x315   : >> { %1844 = vmatprep.mubr.msk.f32.mxu1 %vm978_vm1, %v3016_v19 }
 0x318   : >> { %1845 = vmatmul.mubr.msk.f32.gmra.mxu1 %vm978_vm1, %v3017_v13 }
 0x319   : >> { %1847 = vmatprep.mubr.msk.f32.mxu1 %vm978_vm1, %v3018_v14  ;;  %v1159_v14 = vpop.permute.xlu1 %1158 }
 0x31c   : >> { %1848 = vmatmul.mubr.msk.f32.gmra.mxu1 %vm978_vm1, %v3019_v21 }
 0x31d   : >> { %1850 = vmatprep.mubr.msk.f32.mxu1 %vm978_vm1, %v3020_v16 }
 0x320   : >> { %1851 = vmatmul.mubr.msk.f32.gmra.mxu1 %vm978_vm1, %v3021_v22 }
 0x321   : >> { %1853 = vmatprep.mubr.msk.f32.mxu1 %vm978_vm1, %v3022_v23 }
 0x324   : >> { %1854 = vmatmul.mubr.msk.f32.gmra.mxu1 %vm978_vm1, %v3023_v11  ;;  %v1154_v11 = vpop.permute.xlu0 %1153 }
 0x325   : >> { %1856 = vmatprep.mubr.msk.f32.mxu1 %vm978_vm1, %v3024_v20 }
 0x328   : >> { %1857 = vmatmul.mubr.msk.f32.gmra.mxu1 %vm978_vm1, %v3025_v12 }
 0x3cc   : >> { %v2794_v9 = vpop.f32.mrf.mxu1 }
 0x3ce   : >> { %v2796_v25 = vpop.f32.mrf.mxu1 }
 0x3d0   : >> { %v2798_v26 = vpop.f32.mrf.mxu1 }
 0x3d2   : >> { %v2800_v27 = vpop.f32.mrf.mxu1 }
 0x3d4   : >> { %v1843_v30 = vpop.f32.mrf.mxu1 }
 0x3d6   : >> { %v1330_v6 = vpop.f32.mrf.mxu1 }
 0x3d8   : >> { %v1846_v7 = vpop.f32.mrf.mxu1 }
 0x3da   : >> { %v1340_v33 = vpop.f32.mrf.mxu1 }
 0x3dc   : >> { %v1849_v4 = vpop.f32.mrf.mxu1 }
 0x3de   : >> { %v1350_v5 = vpop.f32.mrf.mxu1 }
 0x3e0   : >> { %v1852_v35 = vpop.f32.mrf.mxu1 }
 0x3e1   : >> { %v1366_v22 = vadd.f32 %v1852_v35, %v1174_v3  ;;  %v1144_v35 = vpop.permute.xlu0 %1143  ;;  %v1346_v3 = vadd.f32 %v1846_v7, %v1154_v11 }
 0x3e2   : >> { %v1360_v28 = vpop.f32.mrf.mxu1 }
 0x3e3   : >> { %v1361_v20 = vadd.f32 %v1360_v28, %v1169_v0 }
 0x3e4   : >> { %v1855_v29 = vpop.f32.mrf.mxu1 }
 0x3e5   : >> { %v1376_v17 = vadd.f32 %v1855_v29, %v1184_v34  ;;  %v1356_v34 = vadd.f32 %v1849_v4, %v1164_v10  ;;  %v1399_v29 = vmax.f32 %v1361_v20, 0.0  ;;  %v1336_v4 = vadd.f32 %v1843_v30, %v1144_v35 }
 0x3e6   : >> { %v1370_v1 = vpop.f32.mrf.mxu1 }
 0x3e7   : >> { %v1371_v21 = vadd.f32 %v1370_v1, %v1179_v2  ;;  %v1402_v23 = vmax.f32 %v1376_v17, 0.0  ;;  %v1351_v2 = vadd.f32 %v1350_v5, %v1159_v14  ;;  %v1398_v1 = vmax.f32 %v1356_v34, 0.0  ;;  %v1134_v5 = vpop.permute.xlu0 %1133 }
 0x3e8   : >> { %v1858_v8 = vpop.f32.mrf.mxu1  ;;  %v1326_v17 = vadd.f32 %v2798_v26, %v1134_v5 }
 0x3e9   : >> { %v1386_v18 = vadd.f32 %v1858_v8, %v1194_v31  ;;  %v1401_v12 = vmax.f32 %v1371_v21, 0.0  ;;  %v1149_v31 = vpop.permute.xlu1 %1148  ;;  %v1397_v8 = vmax.f32 %v1351_v2, 0.0 }
 0x3ea   : >> { %v1380_v15 = vpop.f32.mrf.mxu1  ;;  %v1341_v0 = vadd.f32 %v1340_v33, %v1149_v31  ;;  %v1392_v14 = vmax.f32 %v1326_v17, 0.0 }
 0x3eb   : >> { %v1404_v19 = vmax.f32 %v1386_v18, 0.0  ;;  %v1381_v13 = vadd.f32 %v1380_v15, %v1189_v32  ;;  %v1400_v32 = vmax.f32 %v1366_v22, 0.0  ;;  %v1396_v18 = vmax.f32 %v1346_v3, 0.0 }
 0x3ec   : >> { %v1395_v15 = vmax.f32 %v1341_v0, 0.0 }
 0x3ed   : >> { %v1403_v16 = vmax.f32 %v1381_v13, 0.0  ;;  %1860 = vmatpush3.msra.mxu0 %v1404_v19  ;;  %v1139_v28 = vpop.permute.xlu1 %1138  ;;  %v1394_v19 = vmax.f32 %v1336_v4, 0.0  ;;  %v1124_v13 = vpop.permute.xlu0 %1123 }
 0x3ee   : >> { %1861 = vmatprep.subr.mxu0 %v2017_v24  ;;  %v1331_v10 = vadd.f32 %v1330_v6, %v1139_v28  ;;  %v1316_v6 = vadd.f32 %v2794_v9, %v1124_v13  ;;  %v3026_v9 = vld [vmem:[#allocation56_spill] sm:$0xff] }
 0x3ef   : >> { %1862 = vmatpush3.msra.mxu0 %v1403_v16 }
 0x3f0   : >> { %1863 = vmatprep.subr.mxu0 %v2017_v24  ;;  %v1393_v30 = vmax.f32 %v1331_v10, 0.0 }
 0x3f1   : >> { %1864 = vmatpush3.msra.mxu0 %v1402_v23  ;;  %v1129_v7 = vpop.permute.xlu1 %1128  ;;  %v1408_v23 = vpop.permute.xlu0 %1407 }
 0x3f2   : >> { %1865 = vmatprep.subr.mxu0 %v2017_v24  ;;  %v1321_v33 = vadd.f32 %v2800_v27, %v1129_v7  ;;  %v1390_v27 = vmax.f32 %v1316_v6, 0.0 }
 0x3f3   : >> { %1866 = vmatpush3.msra.mxu0 %v1401_v12 }
 0x3f4   : >> { %1867 = vmatprep.subr.mxu0 %v2017_v24  ;;  %v1391_v16 = vmax.f32 %v1321_v33, 0.0 }
 0x3f5   : >> { %1868 = vmatpush3.msra.mxu0 %v1400_v32  ;;  %v1119_v21 = vpop.permute.xlu1 %1118 }
 0x3f6   : >> { %1869 = vmatprep.subr.mxu0 %v2017_v24  ;;  %v1311_v26 = vadd.f32 %v2796_v25, %v1119_v21 }
 0x3f7   : >> { %1870 = vmatpush3.msra.mxu0 %v1399_v29 }
 0x3f8   : >> { %1871 = vmatprep.subr.mxu0 %v2017_v24  ;;  %v1389_v22 = vmax.f32 %v1311_v26, 0.0 }
 0x3f9   : >> { %1872 = vmatpush3.msra.mxu0 %v1398_v1 }
 0x3fa   : >> { %1873 = vmatprep.subr.mxu0 %v2017_v24 }
 0x3fb   : >> { %1874 = vmatpush3.msra.mxu0 %v1397_v8 }
 0x3fc   : >> { %1875 = vmatprep.subr.mxu0 %v2017_v24 }
 0x3fd   : >> { %1876 = vmatpush3.msra.mxu0 %v1396_v18 }
 0x3fe   : >> { %1877 = vmatprep.subr.mxu0 %v2017_v24 }
 0x3ff   : >> { %1878 = vmatpush3.msra.mxu0 %v1395_v15 }
 0x400   : >> { %1879 = vmatprep.subr.mxu0 %v2017_v24 }
 0x401   : >> { %1880 = vmatpush3.msra.mxu0 %v1394_v19 }
 0x402   : >> { %1881 = vmatprep.subr.mxu0 %v2017_v24 }
 0x403   : >> { %1882 = vmatpush3.msra.mxu0 %v1393_v30 }
 0x404   : >> { %1883 = vmatprep.subr.mxu0 %v2017_v24 }
 0x405   : >> { %1884 = vmatpush3.msra.mxu0 %v1392_v14 }
 0x406   : >> { %1885 = vmatprep.subr.mxu0 %v2017_v24 }
 0x407   : >> { %1886 = vmatpush3.msra.mxu0 %v1391_v16 }
 0x408   : >> { %1887 = vmatprep.subr.mxu0 %v2017_v24 }
 0x409   : >> { %1888 = vmatpush3.msra.mxu0 %v1390_v27 }
 0x40a   : >> { %1889 = vmatprep.subr.mxu0 %v2017_v24 }
 0x40b   : >> { %1890 = vmatpush3.msra.mxu0 %v1389_v22 }
 0x40c   : >> { %1892 = vmatmul.mubr.f32.vlgmr.msra.gmra.mxu0 %v3026_v9 }
 0x4cb   : > { %487 = sbr.rel (!%p485_p11) target bundleno = 66 (0x42), region = 108 }
 0x4cc   : >> { %v1476_v25 = vpop.f32.mrf.mxu0 }
 0x4cd   : >> { %v1477_v11 = vadd.f32 %v1476_v25, %v1408_v23 }
 0x4ce   : >> { %v1893_v20 = vpop.f32.mrf.mxu0 }
 0x4cf   : >> { %1482 = vst [vmem:[%s1481_s30] sm:$0xff] %v1477_v11  ;;  %s1952_s30 = scalar_lea.vmem (%p485_p11), %s1951_s13, 512 }
 0x4d0   : > { %p1954_p2 = scmp.lt.s32.totalorder %s1952_s30, %s1946_s12 }
 0x4d2   : > { %p1955_p3 = por %p1954_p2, %p1953_p1 }
 0x4d4   : > { %p1956_p4 = pnand %p1955_p3, %p1949_p0 }
 0x4d6   : > { %1959 = shalt.err (!%p1956_p4)
}
 0x4d7   : > { %s1960_s21 = scalar_lea.hbm %s1496_s29, 256  ;;  %s1964_s15 = scalar_lea.hbm %s2877_s11, 512 }
 0x4d8   : > { %p1961_p7 = scmp.ne.s32.totalorder %s1496_s29, %s1960_s21  ;;  %p1965_p10 = scmp.lt.s32.totalorder %s1496_s29, %s2877_s11 }
 0x4d9   : > { %p1966_p11 = scmp.lt.s32.totalorder %s1964_s15, %s1960_s21 }
 0x4da   : > { %p1962_p8 = pnand %p1961_p7, %p2118_p5 }
 0x4db   : > { %p1967_p12 = por %p1966_p11, %p1965_p10 }
 0x4dc   : > { %p1963_p9 = pneg %p1962_p8 }
 0x4de   : > { %p1968_p13 = pnand %p1967_p12, %p1963_p9 }
 0x4e0   : > { %1971 = shalt.err (!%p1968_p13)
}
 0x4e1   : > { %1894 = dma.vmem_to_hbm [thread:$0]  (%p2118_p5), %s1499_s14, 256, %s1496_s29, %s1484_s23  }
 0x4e2 PF: > { %p1900_p0 = scmp.ge.s32.totalorder %s2010_s20, 2  ;;  %s1510_s25 = sand.u32 1, %s1998_s17  }
 0x4e3   : > { %s1511_s12 = scalar_lea.sflag [#allocation3], %s1510_s25 }
 0x4e4   : > { %p1897_p1 = pnand %p1900_p0, %p2122_p6 }
 0x4e6   : > { %p1898_p2 = pneg %p1897_p1 }
 0x4e8   : > { %1993 = dma.done.wait (%p1898_p2), %s1511_s12, 256  }
 0x4e9   : > { %1995 = vsyncadd (%p1898_p2), %s1511_s12, 4294967040  ;;  %s3028_s20 = sld [smem:[#allocation6_spill]]  ;;  %s3031_s17 = smov %s2002_s18 }
 0x4ea   : > { %s3029_s19 = sld [smem:[#allocation5_spill]] }
 0x4eb   : > { %s3030_s13 = sld [smem:[#allocation7_spill]] }
 0x4ef   : > { %p21_p3 = scmp.ge.s32.totalorder %s3028_s20, 4  }
 0x4f0   : > { %s3032_s18 = smov %s3029_s19 }
 0x4f1   : > { %s3033_s19 = smov %s3030_s13  ;;  %23 = sbr.rel (!%p21_p3) target bundleno = 3 (0x3), region = 119 }
 0x4f6   :  { %1516 = vsyncpa [#allocation3], 1 }
 0x4f7   :  { %1518 = vsyncpa [#allocation3 + $0x1], 1 }

</bundles_post_ra>
